<compile_context>
chip_gen: v7x
topology: tpu7x:2x2x1
jax: 0.10.0
libtpu: 0.0.40
codegen_flags: <defaults>
</compile_context>

<pallas_src>
import math

import jax
import jax.numpy as jnp
from jax.experimental import pallas as pl
from jax.experimental.pallas import tpu as pltpu


def _block2x2_kernel(w_ref, x_ref, o_ref):
    # w_ref: (2, size) -- row 0 = [A|D], row 1 = [B|C]
    # x_ref / o_ref: (tb, size).  On the ragged last tile the extra rows hold
    # unspecified data; they are computed and then clipped by the output DMA.
    n = x_ref.shape[-1] // 2
    x = x_ref[...]
    w = w_ref[...]
    x_swapped = pltpu.roll(x, shift=n, axis=1)        # [x2 | x1], XLU op (free slot)
    o_ref[...] = w[0:1, :] * x + w[1:2, :] * x_swapped


def _device_tuning():
    """Per-generation (target tile bytes, input buffer depth)."""
    try:
        kind = jax.devices()[0].device_kind.lower()
    except Exception:
        kind = ""
    if "v7" in kind:
        return 4 * 1024 * 1024, 3   # fast HBM: bigger tiles + deeper input prefetch
    if "v6" in kind:
        return 4 * 1024 * 1024, 2   # 32 MiB scoped-VMEM default: 4 MiB tiles fit easily
    return 2 * 1024 * 1024, 2       # v5e & older: 16 MiB scoped-VMEM default


def block2x2diag_forward(abcd, x, *, target_block_bytes=None, x_buffer_count=None):
    """abcd: (stack, 2, 2, size//2); x: (stack, ..., size) -> same shape as x."""
    stack = x.shape[0]
    size = x.shape[-1]
    assert size % 2 == 0, "size must be even"
    n = size // 2
    assert abcd.shape == (stack, 2, 2, n)

    if target_block_bytes is None or x_buffer_count is None:
        tbb, xbc = _device_tuning()
        target_block_bytes = target_block_bytes or tbb
        x_buffer_count = x_buffer_count or xbc

    orig_shape = x.shape
    x_flat = x.reshape(stack, -1, size)               # (stack, batch, size)
    batch = x_flat.shape[1]

    # Lane-dense coefficient slabs: W1 = [A|D], W2 = [B|C]  -> (stack, 2, size).
    w1 = jnp.concatenate([abcd[:, 0, 0, :], abcd[:, 1, 1, :]], axis=-1)
    w2 = jnp.concatenate([abcd[:, 0, 1, :], abcd[:, 1, 0, :]], axis=-1)
    w = jnp.stack([w1, w2], axis=1).astype(x.dtype)

    # Dtype-aware batch tile: multiple of the dtype's sublane packing
    # (8 for 4-byte, 16 for 2-byte, 32 for 1-byte dtypes).
    dtype_bytes = jnp.dtype(x.dtype).itemsize
    sublane_mult = max(8, 32 // dtype_bytes)

    tb = (target_block_bytes // (size * dtype_bytes)) // sublane_mult * sublane_mult
    tb = max(sublane_mult, tb)
    tb = min(tb, pl.cdiv(batch, sublane_mult) * sublane_mult)

    # Guarantee >= 4 total grid steps when possible so both v7x TensorCores
    # (and the software pipeline) get work on small/medium problems.
    min_total_steps = 4
    if stack * pl.cdiv(batch, tb) < min_total_steps:
        want_tiles = min(pl.cdiv(batch, sublane_mult),
                         pl.cdiv(min_total_steps, stack))
        tb_small = max(sublane_mult,
                       pl.cdiv(pl.cdiv(batch, want_tiles), sublane_mult) * sublane_mult)
        tb = min(tb, tb_small)

    num_tiles = pl.cdiv(batch, tb)                    # ragged last tile is clipped

    cost = pl.CostEstimate(
        flops=3 * stack * batch * size,
        transcendentals=0,
        bytes_accessed=(2 * stack * batch * size + stack * 2 * size) * dtype_bytes,
    )

    # Deeper input prefetch only where it pays off (v7x); elsewhere keep the
    # default double-buffering.
    x_spec_kwargs = {}
    if x_buffer_count and x_buffer_count != 2:
        x_spec_kwargs["pipeline_mode"] = pl.Buffered(x_buffer_count)

    out = pl.pallas_call(
        _block2x2_kernel,
        out_shape=jax.ShapeDtypeStruct((stack, batch, size), x.dtype),
        grid=(stack, num_tiles),                      # batch innermost: w block reused
        in_specs=[
            pl.BlockSpec((pl.Squeezed(), 2, size), lambda s, b: (s, 0, 0)),
            pl.BlockSpec((pl.Squeezed(), tb, size), lambda s, b: (s, b, 0),
                         **x_spec_kwargs),
        ],
        out_specs=pl.BlockSpec((pl.Squeezed(), tb, size), lambda s, b: (s, b, 0)),
        compiler_params=pltpu.CompilerParams(
            dimension_semantics=("parallel", "parallel")),
        cost_estimate=cost,
    )(w, x_flat)

    return out.reshape(orig_shape)


# TODO(synk): complex=True variant (complex_mul over trailing (real, imag) pair)
# is not implemented; only the default real path is translated.
# TODO(synk): for size % 128 != 0 the single per-row store becomes lane-masked;
# a batch-on-lanes layout (sublane roll) would be needed to stay store-dense.


if __name__ == "__main__":
    key = jax.random.PRNGKey(0)
    k_x, k_w = jax.random.split(key)

    stack = 2
    size = 256                # size//2 = 128 -> lane-aligned halves
    mid_dims = (4, 3)         # batch = 12 -> exercises the ragged (clipped) last tile

    x = jax.random.normal(k_x, (stack, *mid_dims, size), dtype=jnp.float32)
    scaling = 1.0 / math.sqrt(2)
    abcd = jax.random.normal(k_w, (stack, 2, 2, size // 2), dtype=jnp.float32) * scaling

    out = jax.block_until_ready(block2x2diag_forward(abcd, x))

    # Pure-JAX reference mirroring the PyTorch forward exactly.
    ref = (abcd[:, None, :, :, :] *
           x.reshape(stack, -1, 1, 2, size // 2)).sum(axis=-2).reshape(x.shape)

    assert out.shape == x.shape and out.dtype == x.dtype
    assert jnp.allclose(out, ref, atol=1e-5, rtol=1e-5), "mismatch vs reference"

    print("KERNEL_OK")
</pallas_src>

<mosaic_0001>
module attributes {stable_mosaic.version = 11 : i64} {
  func.func @_block2x2_kernel(%arg0: i32, %arg1: i32, %arg2: memref<1x2x256xf32, #tpu.memory_space<vmem>>, %arg3: memref<1x8x256xf32, #tpu.memory_space<vmem>>, %arg4: memref<1x8x256xf32, #tpu.memory_space<vmem>>) attributes {dimension_semantics = [#tpu.dimension_semantics<parallel>, #tpu.dimension_semantics<parallel>], iteration_bounds = array<i64: 2, 2>, scalar_prefetch = 0 : i64, scratch_operands = 0 : i64, tpu.core_type = #tpu.core_type<tc>, window_params = [{transform_indices = @transform_0, window_bounds = array<i64: 1, 2, 256>}, {transform_indices = @transform_1, window_bounds = array<i64: 1, 8, 256>}, {transform_indices = @transform_2, window_bounds = array<i64: 1, 8, 256>}]} {
    %c0 = arith.constant 0 : index
    %c0_0 = arith.constant 0 : index
    %c0_1 = arith.constant 0 : index
    %0 = vector.load %arg3[%c0, %c0_0, %c0_1] : memref<1x8x256xf32, #tpu.memory_space<vmem>>, vector<1x8x256xf32>
    %1 = vector.shape_cast %0 : vector<1x8x256xf32> to vector<8x256xf32>
    %c0_2 = arith.constant 0 : index
    %c0_3 = arith.constant 0 : index
    %c0_4 = arith.constant 0 : index
    %2 = vector.load %arg2[%c0_2, %c0_3, %c0_4] : memref<1x2x256xf32, #tpu.memory_space<vmem>>, vector<1x2x256xf32>
    %3 = vector.shape_cast %2 : vector<1x2x256xf32> to vector<2x256xf32>
    %c128_i32 = arith.constant 128 : i32
    %4 = tpu.dynamic_rotate %1 by %c128_i32 dim 1 : vector<8x256xf32>, i32 -> vector<8x256xf32>
    %5 = vector.extract_strided_slice %3 {offsets = [0, 0], sizes = [1, 256], strides = [1, 1]} : vector<2x256xf32> to vector<1x256xf32>
    %6 = vector.broadcast %5 : vector<1x256xf32> to vector<8x256xf32>
    %7 = arith.mulf %6, %1 : vector<8x256xf32>
    %8 = vector.extract_strided_slice %3 {offsets = [1, 0], sizes = [1, 256], strides = [1, 1]} : vector<2x256xf32> to vector<1x256xf32>
    %9 = vector.broadcast %8 : vector<1x256xf32> to vector<8x256xf32>
    %10 = arith.mulf %9, %4 : vector<8x256xf32>
    %11 = arith.addf %7, %10 : vector<8x256xf32>
    %c0_5 = arith.constant 0 : index
    %c0_6 = arith.constant 0 : index
    %c0_7 = arith.constant 0 : index
    %12 = vector.load %arg4[%c0_5, %c0_6, %c0_7] : memref<1x8x256xf32, #tpu.memory_space<vmem>>, vector<1x8x256xf32>
    %13 = vector.shape_cast %12 : vector<1x8x256xf32> to vector<8x256xf32>
    %14 = vector.shape_cast %11 : vector<8x256xf32> to vector<1x8x256xf32>
    tpu.vector_store %arg4[%c0_5, %c0_6, %c0_7], %14 {strides = array<i32>} : memref<1x8x256xf32, #tpu.memory_space<vmem>>, vector<1x8x256xf32>,
    return
  }
  func.func @transform_0(%arg0: i32, %arg1: i32) -> (i32, i32, i32) {
    %c0_i32 = arith.constant 0 : i32
    %c0_i32_0 = arith.constant 0 : i32
    %c0_i32_1 = arith.constant 0 : i32
    return %arg0, %c0_i32, %c0_i32_0 : i32, i32, i32
  }
  func.func @transform_1(%arg0: i32, %arg1: i32) -> (i32, i32, i32) {
    %c0_i32 = arith.constant 0 : i32
    %c0_i32_0 = arith.constant 0 : i32
    return %arg0, %arg1, %c0_i32 : i32, i32, i32
  }
  func.func @transform_2(%arg0: i32, %arg1: i32) -> (i32, i32, i32) {
    %c0_i32 = arith.constant 0 : i32
    %c0_i32_0 = arith.constant 0 : i32
    return %arg0, %arg1, %c0_i32 : i32, i32, i32
  }
}

</mosaic_0001>

<bundles_post_ra>
// kernel: tpu_custom_call.1
= control target key start
LH: loop header
LB: loop body
LE: loop exit
PB: predicated region body
PF: predicated region fallthrough
CT: control target
= control target key end

     0   :  { %s466_s9 = smov 0   ;;  %s468_s10 = smov 0   ;;  %s520_s0 = inlined_call_operand.vmem [shape: f32[2,2,256], index: 0, kind: input, shape index: {}]   ;;  %s521_s1 = inlined_call_operand.vmem [shape: f32[2,12,256], index: 1, kind: input, shape index: {}]   ;;  %s522_s2 = inlined_call_operand.vmem [shape: f32[2,12,256], index: 2, kind: output, shape index: {}]  }
   0x1   :  { %s470_s11 = smov 0   ;;  %s472_s12 = smov 0  }
   0x2   :  { %s474_s13 = smov 0  }
   0x3 LB: > { %s21_s14 = sadd.s32 1, %s441_s11  ;;  %s24_s15 = sadd.s32 1, %s445_s12  ;;  %s449_s13 = sphi %s474_s13, %s12_s13   ;;  %s445_s12 = sphi %s472_s12, %s526_s12   ;;  %s441_s11 = sphi %s470_s11, %s525_s11   ;;  %s437_s10 = sphi %s468_s10, %s524_s10   ;;  %s433_s9 = sphi %s466_s9, %s523_s9  }
   0x4   : > { %p22_p0 = scmp.ge.s32.totalorder %s21_s14, 2  ;;  %p359_p1 = scmp.ge.s32.totalorder %s449_s13, 1 }
   0x5   : > { %p142_p2 = scmp.lt.s32.totalorder %s449_s13, 5 }
   0x6   : > { %s528_s14 = smov (%p22_p0, %s21_s14), 0  ;;  %s530_s15 = smov (!%p22_p0, %s24_s15), %s445_s12 }
   0x7   : > { %p143_p3 = pnand %p359_p1, %p142_p2  ;;  %p26_p4 = scmp.ge.s32.totalorder %s530_s15, 2 }
   0x8   : > { %p177_p5 = scmp.lt.s32.totalorder (!%p143_p3), %s437_s10, 1  ;;  %p184_p6 = scmp.lt.s32.totalorder (!%p143_p3), %s433_s9, 1  ;;  %v204_v0 = vlaneseq (!%p143_p3) }
   0x9   : > { %s532_s15 = smov (%p26_p4, %s530_s15), 0  ;;  %146 = sbr.rel (%p143_p3) target bundleno = 29 (0x1d), region = 28 }
   0xa   : > { %v205_v1 = vshrl.u32 (!%p143_p3), %v204_v0, 7 }
   0xc   : > { %v206_v2 = vsub.s32 (!%p143_p3), 0, %v205_v1  ;;  %v226_v3 = vsub.s32 (!%p143_p3), 1, %v205_v1  ;;  %v210_v4 = vsub.s32 (!%p143_p3), 2, %v205_v1  ;;  %v230_v5 = vsub.s32 (!%p143_p3), 3, %v205_v1 }
  0x10   : > { %s534_s10 = smov (!%p177_p5, %s437_s10), 1  ;;  %s536_s9 = smov (!%p184_p6, %s433_s9), 1 }
  0x11   : > { %s370_s16 = sshll.u32 %s534_s10, 2  ;;  %s362_s20 = sshll.u32 %s536_s9, 1 }
  0x12   : > { %s181_s19 = scalar_lea.vmem %s520_s0, %s370_s16  ;;  %s188_s21 = sadd.s32 %s370_s16, %s362_s20 }
  0x13   : > { %v202_v6 = vld [vmem:[%s181_s19] sm:$0xf]  ;;  %s364_s22 = sshll.u32 %s188_s21, 3 }
  0x14   : > { %v207_v7 = vrot.slane %v202_v6, %v206_v2  ;;  %v227_v8 = vrot.slane %v202_v6, %v226_v3  ;;  %v211_v9 = vrot.slane %v202_v6, %v210_v4  ;;  %v231_v10 = vrot.slane %v202_v6, %v230_v5  ;;  %s190_s25 = scalar_lea.vmem %s521_s1, %s364_s22  ;;  %s199_s28 = scalar_lea.vmem %s522_s2, %s364_s22 }
  0x15   : > { %v200_v11 = vld [vmem:[%s190_s25] sm:$0xff]  ;;  %v201_v12 = vld [vmem:[%s190_s25 + $0x8] sm:$0xff] }
  0x16   : > { %v217_v13 = vrot.slane %v207_v7, %v206_v2  ;;  %v237_v14 = vrot.slane %v227_v8, %v226_v3  ;;  %v221_v15 = vrot.slane %v211_v9, %v206_v2  ;;  %v241_v16 = vrot.slane %v231_v10, %v226_v3 }
  0x18   : > { %v222_v17 = vmul.f32 %v217_v13, %v200_v11  ;;  %v242_v18 = vmul.f32 %v237_v14, %v201_v12  ;;  %v223_v19 = vmul.f32 %v221_v15, %v201_v12  ;;  %v243_v20 = vmul.f32 %v241_v16, %v200_v11 }
  0x1a   : > { %v244_v21 = vadd.f32 %v242_v18, %v222_v17  ;;  %v245_v22 = vadd.f32 %v243_v20, %v223_v19 }
  0x1c   : > { %246 = vst [vmem:[%s199_s28] sm:$0xff] %v244_v21  ;;  %247 = vst [vmem:[%s199_s28 + $0x8] sm:$0xff] %v245_v22 }
  0x1d PF: > { %s12_s13 = sadd.s32 1, %s449_s13   ;;  %s523_s9 = smov %s441_s11 }
  0x1e   : > { %p9_p7 = scmp.ge.s32.totalorder %s12_s13, 6   ;;  %s524_s10 = smov %s445_s12 }
  0x1f   : > { %s525_s11 = smov %s528_s14  ;;  %s526_s12 = smov %s532_s15 }
  0x20   :  { %11 = sbr.rel (!%p9_p7) target bundleno = 3 (0x3), region = 61 }

</bundles_post_ra>
